<compile_context>
chip_gen: v6e
topology: v6e:2x2x1
jax: 0.10.0
libtpu: 0.0.40
codegen_flags: <defaults>
</compile_context>

<pallas_src>
import jax
import jax.numpy as jnp
from jax import lax
from jax.experimental import pallas as pl
from jax.experimental.pallas import tpu as pltpu

LN_EPS = 1e-5  # PyTorch nn.LayerNorm default


def _round_up(x, m):
    return (x + m - 1) // m * m


# ----------------------------------------------------------------------------
# Kernels
# ----------------------------------------------------------------------------
def _cn_fused_kernel(x_ref, w_ref, b_ref, o_ref):
    """out = LN_norm(x) @ W_eff + b_eff.

    gamma/beta, W2 (+ residual identity), b2, W and b are all folded into
    W_eff / b_eff at prepare time.  LayerNorm statistics in f32; matmul operand
    dtype == w_ref.dtype (bf16 fast path), f32 accumulation.
    """
    x = x_ref[...].astype(jnp.float32)
    mean = jnp.mean(x, axis=-1, keepdims=True)
    x = x - mean                                    # overwrite: fewer live temps
    var = jnp.mean(x * x, axis=-1, keepdims=True)
    xn = (x * lax.rsqrt(var + LN_EPS)).astype(w_ref.dtype)
    out = jnp.dot(xn, w_ref[...], preferred_element_type=jnp.float32)
    o_ref[...] = (out + b_ref[...]).astype(o_ref.dtype)


def _cn_twogemm_kernel(x_ref, gamma_ref, beta_ref, w2_ref, b2_ref, w_ref, b_ref,
                       o_ref):
    """Module-structure path (correctness reference):
    LN -> (xn @ W2^T + b2 + xn) -> (@ W^T + b)."""
    x = x_ref[...].astype(jnp.float32)
    mean = jnp.mean(x, axis=-1, keepdims=True)
    x = x - mean
    var = jnp.mean(x * x, axis=-1, keepdims=True)
    xn = x * lax.rsqrt(var + LN_EPS) * gamma_ref[...] + beta_ref[...]

    mm = w2_ref.dtype
    h = jnp.dot(xn.astype(mm), w2_ref[...], preferred_element_type=jnp.float32)
    h = h + b2_ref[...] + xn
    out = jnp.dot(h.astype(mm), w_ref[...], preferred_element_type=jnp.float32)
    o_ref[...] = (out + b_ref[...]).astype(o_ref.dtype)


# ----------------------------------------------------------------------------
# One-time weight preparation (NOT the per-call hot path)
# ----------------------------------------------------------------------------
def prepare_classification_node_params(gamma, beta, w2, b2, w, b,
                                       matmul_dtype=jnp.bfloat16,
                                       fuse_gemms=True):
    """Transpose PyTorch [out, in] weights to (in, out), fold the whole op into
    a single GEMM when fuse_gemms=True, and cast matmul operands to the MXU
    dtype.  Do this once at load time.

    NOTE: the fused path folds gamma/beta/residual/b2 into W_eff/b_eff; with
    bf16 W_eff it is within ~5e-2 of the exact module semantics, not
    bit-equivalent.  Use fuse_gemms=False + matmul_dtype=float32 for an exact
    reference.
    """
    D = w2.shape[0]
    H = w.shape[0]

    gamma = jnp.asarray(gamma, jnp.float32)
    beta = jnp.asarray(beta, jnp.float32)
    w2_t = jnp.asarray(w2, jnp.float32).T          # (D, D) in -> out
    b2_r = jnp.asarray(b2, jnp.float32)            # (D,)
    w_t = jnp.asarray(w, jnp.float32).T            # (D, H) in -> out
    b_r = jnp.asarray(b, jnp.float32)              # (H,)

    if fuse_gemms:
        # out = (xn_norm*gamma + beta) @ (W2^T + I) @ W^T + b2 @ W^T + b
        w_eff = (w2_t + jnp.eye(D, dtype=jnp.float32)) @ w_t      # (D, H)
        b_eff = b2_r @ w_t + b_r                                   # (H,)
        # Fold LayerNorm affine: out = xn_norm @ (gamma[:,None]*w_eff)
        #                              + (beta @ w_eff + b_eff)
        b_eff = beta @ w_eff + b_eff
        w_eff = gamma[:, None] * w_eff
        return {
            "fused": True, "D": D, "H": H,
            "w_eff": w_eff.astype(matmul_dtype),
            "b_eff": b_eff.reshape(1, H).astype(jnp.float32),
        }
    return {
        "fused": False, "D": D, "H": H,
        "gamma": gamma.reshape(1, D), "beta": beta.reshape(1, D),
        "w2": w2_t.astype(matmul_dtype), "b2": b2_r.reshape(1, D),
        "w": w_t.astype(matmul_dtype), "b": b_r.reshape(1, H),
    }


# ----------------------------------------------------------------------------
# Tile selection: avoid full-tensor pads, keep >= 2 grid steps for v7x megacore
# ----------------------------------------------------------------------------
def _pick_row_tile(N, row_tile):
    row_tile = max(8, _round_up(row_tile, 8))
    # Cap the tile so the grid has >= 2 steps when N allows (2 TCs on v7x).
    cap = min(row_tile, max(8, _round_up(pl.cdiv(N, 2), 8)))
    best = None
    for tm in range(cap, 7, -8):
        if N % tm == 0:
            best = tm
            break
    # Accept an exact divisor only if it is not degenerately small (per-step
    # overhead ~0.35 us); otherwise pad the tail rows as a fallback.
    if best is not None and best * 4 >= cap:
        return best, N
    return cap, _round_up(N, cap)


# ----------------------------------------------------------------------------
# Forward (hot path)
# ----------------------------------------------------------------------------
def classification_node_forward(x, params, *, row_tile=512,
                                out_dtype=jnp.float32):
    """x: (B, S, D) activations (f32 or bf16); params from
    prepare_classification_node_params."""
    B, S, D = x.shape
    assert D == params["D"], (D, params["D"])
    H = params["H"]
    N = B * S

    tm, N_pad = _pick_row_tile(N, row_tile)

    x2d = x.reshape(N, D)
    if N_pad != N:
        # Fallback only (tm does not divide N): pad the tail rows.
        x2d = jnp.pad(x2d, ((0, N_pad - N), (0, 0)))

    grid = (N_pad // tm,)
    x_spec = pl.BlockSpec((tm, D), lambda i: (i, 0))
    out_spec = pl.BlockSpec((tm, H), lambda i: (i, 0))

    def resident(shape):
        # Constant index_map -> stays VMEM-resident across grid steps;
        # single-buffered since the block never changes.
        try:
            return pl.BlockSpec(shape, lambda i: (0, 0),
                                pipeline_mode=pl.Buffered(1))
        except TypeError:  # older jax without pipeline_mode kwarg
            return pl.BlockSpec(shape, lambda i: (0, 0))

    if params["fused"]:
        kernel = _cn_fused_kernel
        weights = (params["w_eff"], params["b_eff"])
        in_specs = [x_spec, resident((D, H)), resident((1, H))]
        flops = 2 * N_pad * D * H
    else:
        kernel = _cn_twogemm_kernel
        weights = (params["gamma"], params["beta"],
                   params["w2"], params["b2"], params["w"], params["b"])
        in_specs = [x_spec,
                    resident((1, D)), resident((1, D)),
                    resident((D, D)), resident((1, D)),
                    resident((D, H)), resident((1, H))]
        flops = 2 * N_pad * D * (D + H)

    operands = (x2d,) + weights
    out_itemsize = jnp.dtype(out_dtype).itemsize

    # VMEM budget: single-buffered weights + double-buffered x/out tiles
    # + a few (tm, D) f32 compute temporaries, with headroom.
    weight_bytes = sum(int(a.size) * a.dtype.itemsize for a in weights)
    working = (weight_bytes
               + 2 * tm * D * x2d.dtype.itemsize
               + 2 * tm * H * out_itemsize
               + 4 * tm * D * 4)
    try:
        vmem_cap = int(pltpu.get_tpu_info().vmem_capacity_bytes)
    except Exception:
        vmem_cap = 64 * 1024 * 1024  # conservative (v7x per-TC)
    vmem_limit = int(min(max(working + (8 << 20), 32 << 20), vmem_cap))

    bytes_accessed = (sum(int(a.size) * a.dtype.itemsize for a in operands)
                      + N_pad * H * out_itemsize)

    out2d = pl.pallas_call(
        kernel,
        out_shape=jax.ShapeDtypeStruct((N_pad, H), out_dtype),
        grid=grid,
        in_specs=in_specs,
        out_specs=out_spec,
        compiler_params=pltpu.CompilerParams(
            dimension_semantics=("parallel",),   # shard rows across v7x TCs
            vmem_limit_bytes=vmem_limit),
        cost_estimate=pl.CostEstimate(
            flops=flops, transcendentals=N_pad, bytes_accessed=bytes_accessed),
    )(*operands)

    if N_pad != N:
        out2d = out2d[:N]
    return out2d.reshape(B, S, H)


# ----------------------------------------------------------------------------
# Pure-JAX reference mirroring the PyTorch module
# ----------------------------------------------------------------------------
def _reference_forward(x, gamma, beta, w2, b2, w, b):
    mean = jnp.mean(x, axis=-1, keepdims=True)
    var = jnp.mean((x - mean) ** 2, axis=-1, keepdims=True)
    xn = (x - mean) / jnp.sqrt(var + LN_EPS) * gamma + beta
    h = xn @ w2.T + b2 + xn
    return h @ w.T + b


if __name__ == "__main__":
    # Small shapes consistent with the module: (batch, seq, input_dim) -> hidden_dim
    B, S, D, H = 2, 8, 128, 32

    key = jax.random.PRNGKey(0)
    k_x, k_g, k_be, k_w2, k_b2, k_w, k_b = jax.random.split(key, 7)

    x = jax.random.normal(k_x, (B, S, D), dtype=jnp.float32)

    # Deterministic synthetic parameters (not a checkpoint load).
    gamma = 1.0 + 0.1 * jax.random.normal(k_g, (D,), dtype=jnp.float32)
    beta = 0.1 * jax.random.normal(k_be, (D,), dtype=jnp.float32)
    w2 = jax.random.normal(k_w2, (D, D), dtype=jnp.float32) * (1.0 / jnp.sqrt(D))
    b2 = jax.random.normal(k_b2, (D,), dtype=jnp.float32) * 0.01
    w = jax.random.normal(k_w, (H, D), dtype=jnp.float32) * (1.0 / jnp.sqrt(D))
    b = jax.random.normal(k_b, (H,), dtype=jnp.float32) * 0.01

    ref = _reference_forward(x, gamma, beta, w2, b2, w, b)

    # 1) Exact-semantics check: two-GEMM path, f32 matmuls.
    p_exact = prepare_classification_node_params(
        gamma, beta, w2, b2, w, b, matmul_dtype=jnp.float32, fuse_gemms=False)
    out_exact = jax.block_until_ready(classification_node_forward(x, p_exact))
    assert out_exact.shape == (B, S, H), out_exact.shape
    assert jnp.allclose(out_exact, ref, atol=1e-3, rtol=1e-3), "f32 path mismatch"

    # 2) Production default: fused single-GEMM, bf16 MXU operands, f32 LN/acc.
    p_default = prepare_classification_node_params(gamma, beta, w2, b2, w, b)
    out_fused = jax.block_until_ready(classification_node_forward(x, p_default))
    assert out_fused.shape == (B, S, H), out_fused.shape
    assert jnp.allclose(out_fused, ref, atol=5e-2, rtol=5e-2), "fused bf16 mismatch"

    # 3) bf16 activations in (halves input HBM traffic when the producer
    #    already emits bf16); LN statistics still f32 inside the kernel.
    out_bf16_in = jax.block_until_ready(
        classification_node_forward(x.astype(jnp.bfloat16), p_default))
    assert jnp.allclose(out_bf16_in, ref, atol=1e-1, rtol=1e-1), "bf16-input mismatch"

    print("KERNEL_OK")
</pallas_src>

<mosaic_0001>
module attributes {stable_mosaic.version = 11 : i64} {
  func.func @_cn_twogemm_kernel(%arg0: i32, %arg1: memref<8x128xf32, #tpu.memory_space<vmem>>, %arg2: memref<1x128xf32, #tpu.memory_space<vmem>>, %arg3: memref<1x128xf32, #tpu.memory_space<vmem>>, %arg4: memref<128x128xf32, #tpu.memory_space<vmem>>, %arg5: memref<1x128xf32, #tpu.memory_space<vmem>>, %arg6: memref<128x32xf32, #tpu.memory_space<vmem>>, %arg7: memref<1x32xf32, #tpu.memory_space<vmem>>, %arg8: memref<8x32xf32, #tpu.memory_space<vmem>>) attributes {dimension_semantics = [#tpu.dimension_semantics<parallel>], iteration_bounds = array<i64: 2>, scalar_prefetch = 0 : i64, scratch_operands = 0 : i64, tpu.core_type = #tpu.core_type<tc>, window_params = [{transform_indices = @transform_0, window_bounds = array<i64: 8, 128>}, {pipeline_mode = #tpu.pipeline_mode<synchronous>, transform_indices = @transform_1, window_bounds = array<i64: 1, 128>}, {pipeline_mode = #tpu.pipeline_mode<synchronous>, transform_indices = @transform_2, window_bounds = array<i64: 1, 128>}, {pipeline_mode = #tpu.pipeline_mode<synchronous>, transform_indices = @transform_3, window_bounds = array<i64: 128, 128>}, {pipeline_mode = #tpu.pipeline_mode<synchronous>, transform_indices = @transform_4, window_bounds = array<i64: 1, 128>}, {pipeline_mode = #tpu.pipeline_mode<synchronous>, transform_indices = @transform_5, window_bounds = array<i64: 128, 32>}, {pipeline_mode = #tpu.pipeline_mode<synchronous>, transform_indices = @transform_6, window_bounds = array<i64: 1, 32>}, {transform_indices = @transform_7, window_bounds = array<i64: 8, 32>}]} {
    %c0 = arith.constant 0 : index
    %c0_0 = arith.constant 0 : index
    %0 = vector.load %arg1[%c0, %c0_0] : memref<8x128xf32, #tpu.memory_space<vmem>>, vector<8x128xf32>
    %cst = arith.constant dense<0.000000e+00> : vector<8xf32>
    %1 = vector.multi_reduction <add>, %0, %cst [1] : vector<8x128xf32> to vector<8xf32>
    %2 = vector.shape_cast %1 : vector<8xf32> to vector<8x1xf32>
    %cst_1 = arith.constant 1.280000e+02 : f32
    %3 = vector.broadcast %cst_1 : f32 to vector<8x1xf32>
    %4 = arith.divf %2, %3 : vector<8x1xf32>
    %5 = vector.broadcast %4 : vector<8x1xf32> to vector<8x128xf32>
    %6 = arith.subf %0, %5 : vector<8x128xf32>
    %7 = arith.mulf %6, %6 : vector<8x128xf32>
    %cst_2 = arith.constant dense<0.000000e+00> : vector<8xf32>
    %8 = vector.multi_reduction <add>, %7, %cst_2 [1] : vector<8x128xf32> to vector<8xf32>
    %9 = vector.shape_cast %8 : vector<8xf32> to vector<8x1xf32>
    %cst_3 = arith.constant 1.280000e+02 : f32
    %10 = vector.broadcast %cst_3 : f32 to vector<8x1xf32>
    %11 = arith.divf %9, %10 : vector<8x1xf32>
    %cst_4 = arith.constant 9.99999974E-6 : f32
    %12 = vector.broadcast %cst_4 : f32 to vector<8x1xf32>
    %13 = arith.addf %11, %12 : vector<8x1xf32>
    %14 = math.rsqrt %13 : vector<8x1xf32>
    %15 = vector.broadcast %14 : vector<8x1xf32> to vector<8x128xf32>
    %16 = arith.mulf %6, %15 : vector<8x128xf32>
    %c0_5 = arith.constant 0 : index
    %c0_6 = arith.constant 0 : index
    %17 = vector.load %arg2[%c0_5, %c0_6] : memref<1x128xf32, #tpu.memory_space<vmem>>, vector<1x128xf32>
    %18 = vector.broadcast %17 : vector<1x128xf32> to vector<8x128xf32>
    %19 = arith.mulf %16, %18 : vector<8x128xf32>
    %c0_7 = arith.constant 0 : index
    %c0_8 = arith.constant 0 : index
    %20 = vector.load %arg3[%c0_7, %c0_8] : memref<1x128xf32, #tpu.memory_space<vmem>>, vector<1x128xf32>
    %21 = vector.broadcast %20 : vector<1x128xf32> to vector<8x128xf32>
    %22 = arith.addf %19, %21 : vector<8x128xf32>
    %c0_9 = arith.constant 0 : index
    %c0_10 = arith.constant 0 : index
    %23 = vector.load %arg4[%c0_9, %c0_10] : memref<128x128xf32, #tpu.memory_space<vmem>>, vector<128x128xf32>
    %cst_11 = arith.constant dense<0.000000e+00> : vector<8x128xf32>
    %24 = tpu.matmul %22, %23, %cst_11 {dimension_numbers = #tpu.dot_dimension_numbers<[1], [0], [0], [1], [0, 0, 1, 1], [], []>} : vector<8x128xf32>, vector<128x128xf32>, vector<8x128xf32> -> vector<8x128xf32>
    %c0_12 = arith.constant 0 : index
    %c0_13 = arith.constant 0 : index
    %25 = vector.load %arg5[%c0_12, %c0_13] : memref<1x128xf32, #tpu.memory_space<vmem>>, vector<1x128xf32>
    %26 = vector.broadcast %25 : vector<1x128xf32> to vector<8x128xf32>
    %27 = arith.addf %24, %26 : vector<8x128xf32>
    %28 = arith.addf %27, %22 : vector<8x128xf32>
    %c0_14 = arith.constant 0 : index
    %c0_15 = arith.constant 0 : index
    %29 = vector.load %arg6[%c0_14, %c0_15] : memref<128x32xf32, #tpu.memory_space<vmem>>, vector<128x32xf32>
    %cst_16 = arith.constant dense<0.000000e+00> : vector<8x32xf32>
    %30 = tpu.matmul %28, %29, %cst_16 {dimension_numbers = #tpu.dot_dimension_numbers<[1], [0], [0], [1], [0, 0, 1, 1], [], []>} : vector<8x128xf32>, vector<128x32xf32>, vector<8x32xf32> -> vector<8x32xf32>
    %c0_17 = arith.constant 0 : index
    %c0_18 = arith.constant 0 : index
    %31 = vector.load %arg7[%c0_17, %c0_18] : memref<1x32xf32, #tpu.memory_space<vmem>>, vector<1x32xf32>
    %32 = vector.broadcast %31 : vector<1x32xf32> to vector<8x32xf32>
    %33 = arith.addf %30, %32 : vector<8x32xf32>
    %c0_19 = arith.constant 0 : index
    %c0_20 = arith.constant 0 : index
    %34 = vector.load %arg8[%c0_19, %c0_20] : memref<8x32xf32, #tpu.memory_space<vmem>>, vector<8x32xf32>
    tpu.vector_store %arg8[%c0_19, %c0_20], %33 {strides = array<i32>} : memref<8x32xf32, #tpu.memory_space<vmem>>, vector<8x32xf32>,
    return
  }
  func.func @transform_0(%arg0: i32) -> (i32, i32) {
    %c0_i32 = arith.constant 0 : i32
    %c0_i32_0 = arith.constant 0 : i32
    return %arg0, %c0_i32 : i32, i32
  }
  func.func @transform_1(%arg0: i32) -> (i32, i32) {
    %c0_i32 = arith.constant 0 : i32
    %c0_i32_0 = arith.constant 0 : i32
    %c0_i32_1 = arith.constant 0 : i32
    return %c0_i32, %c0_i32_0 : i32, i32
  }
  func.func @transform_2(%arg0: i32) -> (i32, i32) {
    %c0_i32 = arith.constant 0 : i32
    %c0_i32_0 = arith.constant 0 : i32
    %c0_i32_1 = arith.constant 0 : i32
    return %c0_i32, %c0_i32_0 : i32, i32
  }
  func.func @transform_3(%arg0: i32) -> (i32, i32) {
    %c0_i32 = arith.constant 0 : i32
    %c0_i32_0 = arith.constant 0 : i32
    %c0_i32_1 = arith.constant 0 : i32
    return %c0_i32, %c0_i32_0 : i32, i32
  }
  func.func @transform_4(%arg0: i32) -> (i32, i32) {
    %c0_i32 = arith.constant 0 : i32
    %c0_i32_0 = arith.constant 0 : i32
    %c0_i32_1 = arith.constant 0 : i32
    return %c0_i32, %c0_i32_0 : i32, i32
  }
  func.func @transform_5(%arg0: i32) -> (i32, i32) {
    %c0_i32 = arith.constant 0 : i32
    %c0_i32_0 = arith.constant 0 : i32
    %c0_i32_1 = arith.constant 0 : i32
    return %c0_i32, %c0_i32_0 : i32, i32
  }
  func.func @transform_6(%arg0: i32) -> (i32, i32) {
    %c0_i32 = arith.constant 0 : i32
    %c0_i32_0 = arith.constant 0 : i32
    %c0_i32_1 = arith.constant 0 : i32
    return %c0_i32, %c0_i32_0 : i32, i32
  }
  func.func @transform_7(%arg0: i32) -> (i32, i32) {
    %c0_i32 = arith.constant 0 : i32
    %c0_i32_0 = arith.constant 0 : i32
    return %arg0, %c0_i32 : i32, i32
  }
}

</mosaic_0001>

<bundles_post_ra>
// kernel: tpu_custom_call.1
= control target key start
LH: loop header
LB: loop body
LE: loop exit
PB: predicated region body
PF: predicated region fallthrough
CT: control target
= control target key end

     0   :  { %12 = vsyncpa [#allocation3], 0  ;;  %s1071_s0 = inlined_call_operand.vmem [shape: f32[16,128], index: 0, kind: input, shape index: {}]   ;;  %s1072_s1 = inlined_call_operand.vmem [shape: f32[1,128], index: 1, kind: input, shape index: {}]   ;;  %s1073_s2 = inlined_call_operand.vmem [shape: f32[1,128], index: 2, kind: input, shape index: {}]   ;;  %s1074_s3 = inlined_call_operand.vmem [shape: f32[128,128], index: 3, kind: input, shape index: {}]   ;;  %s1075_s4 = inlined_call_operand.vmem [shape: f32[1,128], index: 4, kind: input, shape index: {}]   ;;  %s1076_s5 = inlined_call_operand.vmem [shape: f32[128,32], index: 5, kind: input, shape index: {}]   ;;  %s1077_s6 = inlined_call_operand.vmem [shape: f32[1,32], index: 6, kind: input, shape index: {}]   ;;  %s1078_s7 = inlined_call_operand.hbm [shape: f32[16,32], index: 7, kind: output, shape index: {}]  }
   0x1   :  { %14 = vsyncpa [#allocation3 + $0x1], 0  ;;  %s831_s24 = smov 0   ;;  %s833_s25 = smov 0  }
   0x2   :  { %s835_s26 = smov 0   ;;  %s837_s27 = smov 0  }
   0x3 LB: > { %s852_s28 = sadd.s32 4294967295, %s786_s27   ;;  %s565_s29 = sadd.s32 4294967294, %s786_s27   ;;  %s786_s27 = sphi %s837_s27, %s1084_s27   ;;  %s782_s26 = sphi %s835_s26, %s1083_s26   ;;  %s778_s25 = sphi %s833_s25, %s1082_s25   ;;  %s774_s24 = sphi %s831_s24, %s1081_s24  }
   0x4   : > { %s856_s30 = sadd.s32 1, %s786_s27   ;;  %s179_s8 = sadd.s32 1, %s782_s26 }
   0x5   : > { %s176_s9 = ssub.s32 %s786_s27, %s856_s30  ;;  %p189_p0 = scmp.ne.s32.totalorder %s782_s26, %s778_s25 }
   0x6   : > { %p177_p1 = scmp.eq.s32.totalorder %s176_s9, 0  ;;  %p190_p2 = scmp.eq.s32.totalorder %s852_s28, 1 }
   0x7   : > { %p195_p3 = scmp.ne.s32.totalorder %s778_s25, %s774_s24  ;;  %p196_p4 = scmp.eq.s32.totalorder %s565_s29, 1 }
   0x8   : > { %s867_s10 = scalar_select %p177_p1, %s782_s26, %s179_s8  }
   0x9   : > { %p869_p5 = por %p190_p2, %p189_p0  ;;  %p873_p6 = por %p196_p4, %p195_p3 }
   0xa   : > { %p568_p7 = scmp.ge.s32.totalorder %s786_s27, 1  ;;  %p239_p8 = scmp.lt.s32.totalorder %s786_s27, 3 }
   0xc   : > { %p240_p9 = pnand %p568_p7, %p239_p8 }
   0xd   : > { %p270_p10 = scmp.lt.s32.totalorder (!%p240_p9), %s852_s28, 1  ;;  %s267_s18 = sand.u32 (!%p240_p9), 1, %s778_s25  }
   0xe   : > { %243 = sbr.rel (%p240_p9) target bundleno = 735 (0x2df), region = 48  ;;  %s569_s19 = sshll.u32 (!%p240_p9), %s267_s18, 3 }
   0xf   : > { %s576_s22 = sshll.u32 (!%p240_p9), %s852_s28, 7  ;;  %s269_s23 = scalar_lea.vmem (!%p240_p9), [#allocation2], %s569_s19 }
  0x10   : > { %s506_s29 = sshll.u32 (!%p240_p9), %s269_s23, 4  ;;  %s507_s29 = int_to_ptr.vmem [resolvable:$true] %s506_s29 }
  0x11   : > { %s726_s15 = scalar_lea.vmem (!%p240_p9), %s507_s29, 128 }
  0x12   : > { %p727_p11 = scmp.ne.s32.totalorder (!%p240_p9), %s507_s29, %s726_s15 }
  0x13   : > { %s271_s13 = scalar_select %p270_p10, %s852_s28, 1  ;;  %v318_v1 = vld [vmem:[%s1074_s3 + $0x78] sm:$0xff]  ;;  %v788_v2 = vmov 0.0   ;;  %v317_v3 = vld [vmem:[%s1074_s3 + $0x70] sm:$0xff]  ;;  %v316_v4 = vld [vmem:[%s1074_s3 + $0x68] sm:$0xff]  ;;  %vm789_vm0 = vmmov 0  }
  0x14   : > { %613 = vmatprep.subr.mxu0 %v788_v2  ;;  %648 = vmatprep.subr.mxu1 %v788_v2  ;;  %v315_v5 = vld [vmem:[%s1074_s3 + $0x60] sm:$0xff]  ;;  %v314_v10 = vld [vmem:[%s1074_s3 + $0x58] sm:$0xff]  ;;  %v313_v11 = vld [vmem:[%s1074_s3 + $0x50] sm:$0xff]  ;;  %vm490_vm1 = vcmask 261120   ;;  %p728_p12 = pnand %p727_p11, %p869_p5  ;;  %s790_s28 = smov [#allocation2]  }
  0x15   : > { %s570_s14 = sshll.u32 %s271_s13, 3  ;;  %614 = vmatpush3.msra.mxu0 %v318_v1  ;;  %v312_v12 = vld [vmem:[%s1074_s3 + $0x48] sm:$0xff]  ;;  %v311_v13 = vld [vmem:[%s1074_s3 + $0x40] sm:$0xff]  ;;  %645 = vmatprep.mubr.msk.f32.mxu0 %vm789_vm0, %v788_v2  ;;  %v310_v14 = vld [vmem:[%s1074_s3 + $0x38] sm:$0xff]  ;;  %s1036_s13 = scalar_lea.hbm %s1078_s7, %s576_s22 }
  0x16   : > { %s273_s17 = scalar_lea.vmem %s1071_s0, %s570_s14  ;;  %615 = vmatprep.subr.mxu0 %v788_v2  ;;  %680 = vmatprep.mubr.msk.f32.mxu1 %vm789_vm0, %v788_v2  ;;  %v309_v15 = vld [vmem:[%s1074_s3 + $0x30] sm:$0xff]  ;;  %v308_v16 = vld [vmem:[%s1074_s3 + $0x28] sm:$0xff]  ;;  %v307_v17 = vld [vmem:[%s1074_s3 + $0x20] sm:$0xff]  ;;  %s493_s14 = scalar_lea.sflag [#allocation3], %s267_s18 }
  0x17   : > { %v274_v0 = vld [vmem:[%s273_s17] sm:$0xff]  ;;  %616 = vmatpush3.msra.mxu0 %v317_v3  ;;  %v306_v18 = vld [vmem:[%s1074_s3 + $0x18] sm:$0xff]  ;;  %v305_v19 = vld [vmem:[%s1074_s3 + $0x10] sm:$0xff]  ;;  %p729_p13 = pneg %p728_p12  ;;  %s730_s16 = sshll.u32 %s790_s28, 4  ;;  %s731_s16 = int_to_ptr.vmem [resolvable:$false] %s730_s16 }
  0x18   : > { %275 = vadd.xlane.f32.xlu0 %v274_v0  ;;  %617 = vmatprep.subr.mxu0 %v788_v2  ;;  %v304_v20 = vld [vmem:[%s1074_s3 + $0x8] sm:$0xff]  ;;  %v303_v21 = vld [vmem:[%s1074_s3] sm:$0xff]  ;;  %v412_v22 = vld [vmem:[%s1076_s5 + $0x78] sm:$0xff]  ;;  %s732_s17 = scalar_lea.vmem %s731_s16, 256  ;;  %p733_p0 = scmp.lt.s32.totalorder %s507_s29, %s731_s16 }
  0x19   : > { %618 = vmatpush3.msra.mxu0 %v316_v4  ;;  %v411_v23 = vld [vmem:[%s1076_s5 + $0x70] sm:$0xff]  ;;  %649 = vmatpush3.msra.mxu1 %v412_v22  ;;  %v410_v24 = vld [vmem:[%s1076_s5 + $0x68] sm:$0xff]  ;;  %v409_v25 = vld [vmem:[%s1076_s5 + $0x60] sm:$0xff]  ;;  %p734_p1 = scmp.lt.s32.totalorder %s732_s17, %s726_s15 }
  0x1a   : > { %619 = vmatprep.subr.mxu0 %v788_v2  ;;  %650 = vmatprep.subr.mxu1 %v788_v2  ;;  %v408_v26 = vld [vmem:[%s1076_s5 + $0x58] sm:$0xff]  ;;  %v407_v27 = vld [vmem:[%s1076_s5 + $0x50] sm:$0xff]  ;;  %v406_v28 = vld [vmem:[%s1076_s5 + $0x48] sm:$0xff] }
  0x1b   : > { %620 = vmatpush3.msra.mxu0 %v315_v5  ;;  %651 = vmatpush3.msra.mxu1 %v411_v23  ;;  %v405_v29 = vld [vmem:[%s1076_s5 + $0x40] sm:$0xff]  ;;  %v404_v30 = vld [vmem:[%s1076_s5 + $0x38] sm:$0xff]  ;;  %v403_v31 = vld [vmem:[%s1076_s5 + $0x30] sm:$0xff]  ;;  %p735_p2 = por %p734_p1, %p733_p0 }
  0x1c   : > { %621 = vmatprep.subr.mxu0 %v788_v2  ;;  %652 = vmatprep.subr.mxu1 %v788_v2  ;;  %v402_v32 = vld [vmem:[%s1076_s5 + $0x28] sm:$0xff]  ;;  %v401_v33 = vld [vmem:[%s1076_s5 + $0x20] sm:$0xff]  ;;  %v400_v34 = vld [vmem:[%s1076_s5 + $0x18] sm:$0xff] }
  0x1d   : > { %622 = vmatpush3.msra.mxu0 %v314_v10  ;;  %653 = vmatpush3.msra.mxu1 %v410_v24  ;;  %v571_v39 = vld [vmem:[%s1072_s1] ss:$0 sm:$0xff]  ;;  %v399_v44 = vld [vmem:[%s1076_s5 + $0x10] sm:$0xff]  ;;  %v398_v45 = vld [vmem:[%s1076_s5 + $0x8] sm:$0xff]  ;;  %p736_p3 = pnand %p735_p2, %p729_p13 }
  0x1e   : > { %623 = vmatprep.subr.mxu0 %v788_v2  ;;  %654 = vmatprep.subr.mxu1 %v788_v2  ;;  %v572_v41 = vld [vmem:[%s1073_s2] ss:$0 sm:$0xff] }
  0x1f   : > { %624 = vmatpush3.msra.mxu0 %v313_v11  ;;  %655 = vmatpush3.msra.mxu1 %v409_v25  ;;  %v397_v46 = vld [vmem:[%s1076_s5] sm:$0xff] }
  0x20   : > { %625 = vmatprep.subr.mxu0 %v788_v2  ;;  %656 = vmatprep.subr.mxu1 %v788_v2  ;;  %v573_v47 = vld [vmem:[%s1075_s4] ss:$0 sm:$0xff] }
  0x21   : > { %626 = vmatpush3.msra.mxu0 %v312_v12  ;;  %657 = vmatpush3.msra.mxu1 %v408_v26  ;;  %v574_v52 = vld [vmem:[%s1077_s6] ss:$0 sm:$0xff] }
  0x22   : > { %627 = vmatprep.subr.mxu0 %v788_v2  ;;  %658 = vmatprep.subr.mxu1 %v788_v2 }
  0x23   : > { %628 = vmatpush3.msra.mxu0 %v311_v13  ;;  %659 = vmatpush3.msra.mxu1 %v407_v27 }
  0x24   : > { %629 = vmatprep.subr.mxu0 %v788_v2  ;;  %660 = vmatprep.subr.mxu1 %v788_v2 }
  0x25   : > { %630 = vmatpush3.msra.mxu0 %v310_v14  ;;  %661 = vmatpush3.msra.mxu1 %v406_v28 }
  0x26   : > { %631 = vmatprep.subr.mxu0 %v788_v2  ;;  %662 = vmatprep.subr.mxu1 %v788_v2 }
  0x27   : > { %632 = vmatpush3.msra.mxu0 %v309_v15  ;;  %663 = vmatpush3.msra.mxu1 %v405_v29 }
  0x28   : > { %633 = vmatprep.subr.mxu0 %v788_v2  ;;  %664 = vmatprep.subr.mxu1 %v788_v2 }
  0x29   : > { %634 = vmatpush3.msra.mxu0 %v308_v16  ;;  %665 = vmatpush3.msra.mxu1 %v404_v30 }
  0x2a   : > { %635 = vmatprep.subr.mxu0 %v788_v2  ;;  %666 = vmatprep.subr.mxu1 %v788_v2 }
  0x2b   : > { %636 = vmatpush3.msra.mxu0 %v307_v17  ;;  %667 = vmatpush3.msra.mxu1 %v403_v31 }
  0x2c   : > { %637 = vmatprep.subr.mxu0 %v788_v2  ;;  %668 = vmatprep.subr.mxu1 %v788_v2 }
  0x2d   : > { %638 = vmatpush3.msra.mxu0 %v306_v18  ;;  %669 = vmatpush3.msra.mxu1 %v402_v32 }
  0x2e   : > { %639 = vmatprep.subr.mxu0 %v788_v2  ;;  %670 = vmatprep.subr.mxu1 %v788_v2 }
  0x2f   : > { %640 = vmatpush3.msra.mxu0 %v305_v19  ;;  %671 = vmatpush3.msra.mxu1 %v401_v33 }
  0x30   : > { %641 = vmatprep.subr.mxu0 %v788_v2  ;;  %672 = vmatprep.subr.mxu1 %v788_v2 }
  0x31   : > { %642 = vmatpush3.msra.mxu0 %v304_v20  ;;  %673 = vmatpush3.msra.mxu1 %v400_v34 }
  0x32   : > { %643 = vmatprep.subr.mxu0 %v788_v2  ;;  %674 = vmatprep.subr.mxu1 %v788_v2 }
  0x33   : > { %644 = vmatpush3.msra.mxu0 %v303_v21  ;;  %675 = vmatpush3.msra.mxu1 %v399_v44 }
  0x34   : > { %676 = vmatprep.subr.mxu1 %v788_v2 }
  0x35   : > { %677 = vmatpush3.msra.mxu1 %v398_v45 }
  0x36   : > { %678 = vmatprep.subr.mxu1 %v788_v2 }
  0x37   : > { %679 = vmatpush3.msra.mxu1 %v397_v46 }
  0xa1   : > { %v276_v6 = vpop.xlane.xlu0 %275 }
  0xa2   : > { %v278_v7 = vmul.f32 0.0078125, %v276_v6 }
  0xa4   : > { %v902_v8 = vsub.f32 %v274_v0, %v278_v7 }
  0xa6   : > { %v280_v9 = vmul.f32 %v902_v8, %v902_v8 }
  0xa8   : > { %281 = vadd.xlane.f32.xlu0 %v280_v9 }
 0x131   : > { %v282_v35 = vpop.xlane.xlu0 %281 }
 0x132   : > { %v283_v36 = vmul.f32 0.0078125, %v282_v35 }
 0x134   : > { %v284_v37 = vadd.f32 1e-05, %v283_v36 }
 0x136   : > { %724 = vrsqrt.f32 %v284_v37 }
 0x143   : > { %v725_v38 = vpop.eup %724 }
 0x144   : > { %v286_v40 = vmul.f32 %v725_v38, %v902_v8 }
 0x146   : > { %v294_v42 = vmul.f32 %v571_v39, %v286_v40 }
 0x148   : > { %v302_v43 = vadd.f32 %v572_v41, %v294_v42 }
 0x14a   : > { %646 = vmatmul.mubr.f32.vlgmr.msra.gmra.mxu0 %v302_v43 }
 0x20a   : > { %v392_v48 = vpop.f32.mrf.mxu0 }
 0x20b   : > { %v393_v49 = vadd.f32 %v573_v47, %v392_v48 }
 0x20c   : > { %v647_v50 = vpop.f32.mrf.mxu0 }
 0x20d   : > { %v396_v51 = vadd.f32 %v393_v49, %v302_v43 }
 0x20f   : > { %681 = vmatmul.mubr.f32.vlgmr.msra.gmra.mxu1 %v396_v51 }
 0x2cf   : > { %v486_v53 = vpop.f32.mrf.mxu1 }
 0x2d0   : > { %v487_v54 = vadd.f32 %v574_v52, %v486_v53 }
 0x2d1   : > { %v682_v55 = vpop.f32.mrf.mxu1 }
 0x2d2   : > { %491 = vst.msk [vmem:[%s269_s23] sm:$0xff] %vm490_vm1, %v487_v54 }
 0x2d3   : > { %739 = shalt.err (!%p736_p3)
}
 0x2d4   : > { %s740_s19 = scalar_lea.hbm %s1036_s13, 128  ;;  %s744_s21 = scalar_lea.hbm %s1078_s7, 256 }
 0x2d5   : > { %p741_p4 = scmp.ne.s32.totalorder %s1036_s13, %s740_s19  ;;  %p745_p9 = scmp.lt.s32.totalorder %s1036_s13, %s1078_s7 }
 0x2d6   : > { %p746_p10 = scmp.lt.s32.totalorder %s744_s21, %s740_s19 }
 0x2d7   : > { %p742_p7 = pnand %p741_p4, %p869_p5 }
 0x2d8   : > { %p747_p11 = por %p746_p10, %p745_p9 }
 0x2d9   : > { %p743_p8 = pneg %p742_p7 }
 0x2db   : > { %p748_p12 = pnand %p747_p11, %p743_p8 }
 0x2dd   : > { %751 = shalt.err (!%p748_p12)
}
 0x2de   : > { %683 = dma.vmem_to_hbm [thread:$0]  (%p869_p5), %s507_s29, 128, %s1036_s13, %s493_s14  }
 0x2df PF: > { %p689_p13 = scmp.ge.s32.totalorder %s786_s27, 2  ;;  %s518_s8 = sand.u32 1, %s774_s24  }
 0x2e0   : > { %s519_s9 = scalar_lea.sflag [#allocation3], %s518_s8 }
 0x2e1   : > { %p686_p0 = pnand %p689_p13, %p873_p6 }
 0x2e3   : > { %p687_p1 = pneg %p686_p0 }
 0x2e5   : > { %769 = dma.done.wait (%p687_p1), %s519_s9, 128  }
 0x2e6   : > { %771 = vsyncadd (%p687_p1), %s519_s9, 4294967168  ;;  %p17_p2 = scmp.ge.s32.totalorder %s856_s30, 4   ;;  %s1081_s24 = smov %s778_s25 }
 0x2e7   : > { %s1082_s25 = smov %s782_s26  ;;  %s1083_s26 = smov %s867_s10 }
 0x2e8   : > { %s1084_s27 = smov %s856_s30  ;;  %19 = sbr.rel (!%p17_p2) target bundleno = 3 (0x3), region = 83 }
 0x2ed   :  { %524 = vsyncpa [#allocation3], 1 }
 0x2ee   :  { %526 = vsyncpa [#allocation3 + $0x1], 1 }

</bundles_post_ra>
